<compile_context>
chip_gen: v7x
topology: tpu7x:2x2x1
jax: 0.10.0
libtpu: 0.0.40
codegen_flags: <defaults>
</compile_context>

<pallas_src>
import jax
import jax.numpy as jnp
from jax.experimental import pallas as pl
from jax.experimental.pallas import tpu as pltpu

EPS = 1e-5     # BatchNorm2d default eps
LANE = 128     # TPU lane width


def _round_up(x, m):
    return (x + m - 1) // m * m


def _vmem_limit_bytes():
    """Scoped-VMEM limit derived from the actual chip (v5e/v6e 128 MiB, v7x 64 MiB)."""
    cap = 64 * 1024 * 1024
    try:
        info = pltpu.get_tpu_info()
        c = int(getattr(info, "vmem_capacity_bytes", 0) or 0)
        if c > 0:
            cap = c
    except Exception:
        pass
    # Leave headroom for compiler-internal scratch; never request more than 100 MiB.
    return max(32 * 1024 * 1024, min(cap * 3 // 4, 100 * 1024 * 1024))


def _pick_band(h, budget_bytes, working_set_bytes):
    """Largest band height TH (<= H) whose per-step working set fits the budget."""
    th = 1
    for t in range(1, h + 1):
        if working_set_bytes(t) <= budget_bytes:
            th = t
    # If even TH=1 overflows the budget we still return 1; the raised
    # vmem_limit_bytes gives the compiler the best chance of fitting it.
    return th


# ------------------------------- pass 1 kernels -------------------------------

def _conv_bn_stats_epilogue(patch, w_ref, y_ref, st_ref, th, w, h_valid, masked):
    """Shared tail: one bf16 MXU matmul (f32 accumulate), bf16 y store, f32 BN
    partial sums.  Padded rows are masked out so tiling never changes the stats."""
    cout_p = w_ref.shape[-1]
    y = jnp.dot(patch, w_ref[...], preferred_element_type=jnp.float32)   # (th*w, cout_p)
    y_ref[0] = y.reshape(th, w, cout_p).astype(y_ref.dtype)              # bf16 HBM write
    if masked:  # ragged last band: rows >= H contribute nothing to the batch stats
        rows = (pl.program_id(1) * th
                + jax.lax.broadcasted_iota(jnp.int32, (th * w, 1), 0) // w)
        y = y * (rows < h_valid).astype(jnp.float32)
    s = jnp.sum(y, axis=0, keepdims=True)         # (1, cout_p) per-channel sum
    sq = jnp.sum(y * y, axis=0, keepdims=True)    # (1, cout_p) per-channel sum of squares
    st_ref[0] = jnp.concatenate([s, sq], axis=0)  # (2, cout_p), no zero-padding block


def _make_packed_kernel(h_valid, masked):
    """Small-Cin path: wrapper already packed (kh,kw,ci) into K lanes; no scratch."""
    def kernel(xc_ref, w_ref, y_ref, st_ref):
        _, th, w, kp = xc_ref.shape
        patch = xc_ref[0].reshape(th * w, kp)              # bf16, lane-dense
        _conv_bn_stats_epilogue(patch, w_ref, y_ref, st_ref, th, w, h_valid, masked)
    return kernel


def _make_im2col_kernel(h_valid, masked):
    """General path: build a bf16 im2col patch in VMEM from the halo'ed f32 band."""
    def kernel(xb_ref, w_ref, y_ref, st_ref, patch_ref):
        _, thp2, wp2, cin_p = xb_ref.shape
        th, w = thp2 - 2, wp2 - 2
        # 9 lane-aligned column slabs (cin_p is a multiple of 128), cast to bf16 so the
        # scratch and vst traffic are half of the f32 version.
        for kh in range(3):
            for kw in range(3):
                tap = kh * 3 + kw
                patch_ref[:, tap * cin_p:(tap + 1) * cin_p] = (
                    xb_ref[0, kh:kh + th, kw:kw + w, :]
                    .reshape(th * w, cin_p).astype(jnp.bfloat16))
        _conv_bn_stats_epilogue(patch_ref[...], w_ref, y_ref, st_ref,
                                th, w, h_valid, masked)
    return kernel


# -------------------------------- pass 2 kernel --------------------------------

def _bn_relu_kernel(y_ref, scale_ref, shift_ref, o_ref):
    """Fused BatchNorm (pre-folded per-channel scale/shift) + ReLU; bf16 in, f32 out."""
    y = y_ref[...].astype(jnp.float32)
    o_ref[...] = jnp.maximum(y * scale_ref[...] + shift_ref[...], 0.0)


# ---------------------------------- wrapper ------------------------------------

def conv_block_forward(x_nchw, weight_oihw, gamma, beta):
    """ConvBlock forward. x_nchw: (N, Cin, H, W) f32. Returns (N, Cout, H, W) f32."""
    N, Cin, H, W = x_nchw.shape
    Cout = weight_oihw.shape[0]
    cout_p = _round_up(Cout, LANE)

    vmem_limit = _vmem_limit_bytes()
    budget = int(vmem_limit * 0.8)

    x = jnp.transpose(x_nchw, (0, 2, 3, 1)).astype(jnp.float32)        # NHWC

    # Small-Cin layers: pack (kh,kw,ci) before lane padding -> K = ceil(9*Cin/128)*128
    # instead of 9 * ceil(Cin/128)*128 (up to ~9x fewer MACs, no im2col scratch).
    packed = _round_up(9 * Cin, LANE) <= 2 * _round_up(Cin, LANE)

    if packed:
        kp = _round_up(9 * Cin, LANE)

        def working_set(t):
            return (2 * t * W * kp * 2            # packed input band (bf16, x2 buffers)
                    + 2 * kp * cout_p * 2         # weight            (bf16, x2 buffers)
                    + 2 * t * W * cout_p * 2      # y band            (bf16, x2 buffers)
                    + 4 * 2 * cout_p * 4          # stats blocks
                    + t * W * cout_p * 4          # f32 matmul accumulator
                    + t * W * kp * 2)             # in-flight patch value

        th = _pick_band(H, budget, working_set)
        if N == 1 and th >= H and H > 1:          # keep >= 2 grid points (v7x has 2 TCs)
            th = (H + 1) // 2
        n_hb = -(-H // th)
        h_pad = n_hb * th

        xs = jnp.pad(x, ((0, 0), (1, 1), (1, 1), (0, 0)))               # conv zero pad
        cols = jnp.concatenate(
            [xs[:, kh:kh + H, kw:kw + W, :] for kh in range(3) for kw in range(3)],
            axis=-1)                                                     # (N, H, W, 9*Cin)
        cols = jnp.pad(cols, ((0, 0), (0, h_pad - H), (0, 0), (0, kp - 9 * Cin)))
        cols = cols.astype(jnp.bfloat16)

        wcol = jnp.transpose(weight_oihw, (2, 3, 1, 0)).reshape(9 * Cin, Cout)
        wcol = jnp.pad(wcol, ((0, kp - 9 * Cin), (0, cout_p - Cout))).astype(jnp.bfloat16)

        kernel = _make_packed_kernel(H, h_pad != H)
        in_specs = [
            pl.BlockSpec((1, th, W, kp), lambda n, i: (n, i, 0, 0)),
            pl.BlockSpec((kp, cout_p), lambda n, i: (0, 0)),
        ]
        scratch_shapes = []
        args = (cols, wcol)
    else:
        cin_p = _round_up(Cin, LANE)

        def working_set(t):
            return (2 * (t + 2) * (W + 2) * cin_p * 4   # halo'ed input band (f32, x2)
                    + 2 * 9 * cin_p * cout_p * 2        # weight             (bf16, x2)
                    + t * W * 9 * cin_p * 2             # bf16 im2col scratch (single)
                    + 2 * t * W * cout_p * 2            # y band             (bf16, x2)
                    + 4 * 2 * cout_p * 4                # stats blocks
                    + t * W * cout_p * 4)               # f32 matmul accumulator

        th = _pick_band(H, budget, working_set)
        if N == 1 and th >= H and H > 1:
            th = (H + 1) // 2
        n_hb = -(-H // th)
        h_pad = n_hb * th

        # TODO(synk): replace the wrapper-side halo stacking with memory_space=pl.ANY +
        # manual make_async_copy double-buffering to avoid one extra HBM pass over x.
        xp = jnp.pad(x, ((0, 0), (1, 1 + h_pad - H), (1, 1), (0, cin_p - Cin)))
        xb = jnp.stack([xp[:, i * th:i * th + th + 2] for i in range(n_hb)], axis=1)
        xb = xb.reshape(N * n_hb, th + 2, W + 2, cin_p)

        wt = jnp.transpose(weight_oihw, (2, 3, 1, 0)).astype(jnp.float32)   # OIHW->HWIO
        wt = jnp.pad(wt, ((0, 0), (0, 0), (0, cin_p - Cin), (0, cout_p - Cout)))
        w2 = wt.reshape(9 * cin_p, cout_p).astype(jnp.bfloat16)

        kernel = _make_im2col_kernel(H, h_pad != H)
        in_specs = [
            pl.BlockSpec((1, th + 2, W + 2, cin_p),
                         lambda n, i: (n * n_hb + i, 0, 0, 0)),
            pl.BlockSpec((9 * cin_p, cout_p), lambda n, i: (0, 0)),
        ]
        scratch_shapes = [pltpu.VMEM((th * W, 9 * cin_p), jnp.bfloat16)]
        args = (xb, w2)

    cparams = pltpu.CompilerParams(
        dimension_semantics=("parallel", "parallel"),
        vmem_limit_bytes=vmem_limit)

    # ---- pass 1: conv (one bf16 MXU matmul per band) + exact per-band BN partials ----
    y, stats = pl.pallas_call(
        kernel,
        out_shape=(
            jax.ShapeDtypeStruct((N, h_pad, W, cout_p), jnp.bfloat16),
            jax.ShapeDtypeStruct((N * n_hb, 2, cout_p), jnp.float32),
        ),
        grid=(N, n_hb),
        in_specs=in_specs,
        out_specs=(
            pl.BlockSpec((1, th, W, cout_p), lambda n, i: (n, i, 0, 0)),
            pl.BlockSpec((1, 2, cout_p), lambda n, i: (n * n_hb + i, 0, 0)),
        ),
        scratch_shapes=scratch_shapes,
        compiler_params=cparams,
    )(*args)

    # ---- finalize BN statistics (tiny per-channel math, done once in JAX) ----
    cnt = float(N * H * W)
    mean = jnp.sum(stats[:, 0, :], axis=0) / cnt
    var = jnp.maximum(jnp.sum(stats[:, 1, :], axis=0) / cnt - mean * mean, 0.0)
    # TODO(synk): E[y^2]-E[y]^2 in f32 can cancel for large-mean activations; add a
    # centered second stats pass if tighter parity with PyTorch is ever required.
    g = jnp.pad(gamma.astype(jnp.float32), (0, cout_p - Cout))
    b = jnp.pad(beta.astype(jnp.float32), (0, cout_p - Cout))
    inv = jax.lax.rsqrt(var + EPS)
    scale = (g * inv).reshape(1, cout_p)
    shift = (b - mean * g * inv).reshape(1, cout_p)

    # ---- pass 2: fused normalize + affine + ReLU (memory-bound; bf16 reads of y) ----
    out = pl.pallas_call(
        _bn_relu_kernel,
        out_shape=jax.ShapeDtypeStruct((N, h_pad, W, cout_p), jnp.float32),
        grid=(N, n_hb),
        in_specs=[
            pl.BlockSpec((1, th, W, cout_p), lambda n, i: (n, i, 0, 0)),
            pl.BlockSpec((1, cout_p), lambda n, i: (0, 0)),
            pl.BlockSpec((1, cout_p), lambda n, i: (0, 0)),
        ],
        out_specs=pl.BlockSpec((1, th, W, cout_p), lambda n, i: (n, i, 0, 0)),
        compiler_params=cparams,
    )(y, scale, shift)

    # Drop row/channel padding, back to the module's NCHW output layout.
    return jnp.transpose(out[:, :H, :, :Cout], (0, 3, 1, 2))


def reference_forward(x_nchw, weight_oihw, gamma, beta):
    """Pure-JAX f32 reference of the same forward pass (for correctness check)."""
    y = jax.lax.conv_general_dilated(
        x_nchw, weight_oihw, window_strides=(1, 1), padding=((1, 1), (1, 1)),
        dimension_numbers=("NCHW", "OIHW", "NCHW"))
    mean = jnp.mean(y, axis=(0, 2, 3), keepdims=True)
    var = jnp.mean((y - mean) ** 2, axis=(0, 2, 3), keepdims=True)
    y = (y - mean) * jax.lax.rsqrt(var + EPS)
    y = y * gamma.reshape(1, -1, 1, 1) + beta.reshape(1, -1, 1, 1)
    return jnp.maximum(y, 0.0)


if __name__ == "__main__":
    key = jax.random.PRNGKey(0)
    k1, k2, k3, k4 = jax.random.split(key, 4)

    # ---- test 1: ConvBlock(4, 8) on (2, 4, 16, 16): small-Cin tap-packed path ----
    N, Cin, Cout, H, W = 2, 4, 8, 16, 16
    x = jax.random.normal(k1, (N, Cin, H, W), dtype=jnp.float32)
    w = 0.1 * jax.random.normal(k2, (Cout, Cin, 3, 3), dtype=jnp.float32)
    gamma = jnp.ones((Cout,), dtype=jnp.float32)     # BatchNorm2d init: gamma = 1
    beta = jnp.zeros((Cout,), dtype=jnp.float32)     #                   beta  = 0
    out = jax.block_until_ready(conv_block_forward(x, w, gamma, beta))
    ref = reference_forward(x, w, gamma, beta)
    assert out.shape == (N, Cout, H, W)
    # bf16 MXU operands (per perf review) => tolerance sized for bf16 rounding.
    assert jnp.allclose(out, ref, rtol=2e-2, atol=2e-2), "mismatch (packed path)"

    # ---- test 2: larger Cin + ragged H: in-kernel im2col path, masked BN stats ----
    N, Cin, Cout, H, W = 1, 192, 64, 9, 16
    x = jax.random.normal(k3, (N, Cin, H, W), dtype=jnp.float32)
    w = 0.05 * jax.random.normal(k4, (Cout, Cin, 3, 3), dtype=jnp.float32)
    gamma = 1.0 + 0.5 * jnp.arange(Cout, dtype=jnp.float32) / Cout
    beta = 0.01 * jnp.arange(Cout, dtype=jnp.float32)
    out = jax.block_until_ready(conv_block_forward(x, w, gamma, beta))
    ref = reference_forward(x, w, gamma, beta)
    assert out.shape == (N, Cout, H, W)
    assert jnp.allclose(out, ref, rtol=2e-2, atol=2e-2), "mismatch (im2col path)"

    print("KERNEL_OK")
</pallas_src>

<mosaic_0001>
module attributes {stable_mosaic.version = 11 : i64} {
  func.func @kernel(%arg0: i32, %arg1: i32, %arg2: memref<1x16x16x128xbf16, #tpu.memory_space<vmem>>, %arg3: memref<128x128xbf16, #tpu.memory_space<vmem>>, %arg4: memref<1x16x16x128xbf16, #tpu.memory_space<vmem>>, %arg5: memref<1x2x128xf32, #tpu.memory_space<vmem>>) attributes {dimension_semantics = [#tpu.dimension_semantics<parallel>, #tpu.dimension_semantics<parallel>], iteration_bounds = array<i64: 2, 1>, scalar_prefetch = 0 : i64, scratch_operands = 0 : i64, tpu.core_type = #tpu.core_type<tc>, window_params = [{transform_indices = @transform_0, window_bounds = array<i64: 1, 16, 16, 128>}, {pipeline_mode = #tpu.pipeline_mode<synchronous>, transform_indices = @transform_1, window_bounds = array<i64: 128, 128>}, {transform_indices = @transform_2, window_bounds = array<i64: 1, 16, 16, 128>}, {transform_indices = @transform_3, window_bounds = array<i64: 1, 2, 128>}]} {
    %c0 = arith.constant 0 : index
    %c0_0 = arith.constant 0 : index
    %c0_1 = arith.constant 0 : index
    %c0_2 = arith.constant 0 : index
    %0 = vector.load %arg2[%c0, %c0_0, %c0_1, %c0_2] : memref<1x16x16x128xbf16, #tpu.memory_space<vmem>>, vector<1x16x16x128xbf16>
    %1 = vector.shape_cast %0 : vector<1x16x16x128xbf16> to vector<16x16x128xbf16>
    %2 = vector.shape_cast %1 : vector<16x16x128xbf16> to vector<256x128xbf16>
    %c0_3 = arith.constant 0 : index
    %c0_4 = arith.constant 0 : index
    %3 = vector.load %arg3[%c0_3, %c0_4] : memref<128x128xbf16, #tpu.memory_space<vmem>>, vector<128x128xbf16>
    %cst = arith.constant dense<0.000000e+00> : vector<256x128xf32>
    %4 = tpu.matmul %2, %3, %cst {dimension_numbers = #tpu.dot_dimension_numbers<[1], [0], [0], [1], [0, 0, 1, 1], [], []>} : vector<256x128xbf16>, vector<128x128xbf16>, vector<256x128xf32> -> vector<256x128xf32>
    %5 = vector.shape_cast %4 : vector<256x128xf32> to vector<16x16x128xf32>
    %6 = arith.truncf %5 : vector<16x16x128xf32> to vector<16x16x128xbf16>
    %c0_5 = arith.constant 0 : index
    %c0_6 = arith.constant 0 : index
    %c0_7 = arith.constant 0 : index
    %c0_8 = arith.constant 0 : index
    %7 = vector.load %arg4[%c0_5, %c0_6, %c0_7, %c0_8] : memref<1x16x16x128xbf16, #tpu.memory_space<vmem>>, vector<1x16x16x128xbf16>
    %8 = vector.shape_cast %7 : vector<1x16x16x128xbf16> to vector<16x16x128xbf16>
    %9 = vector.shape_cast %6 : vector<16x16x128xbf16> to vector<1x16x16x128xbf16>
    tpu.vector_store %arg4[%c0_5, %c0_6, %c0_7, %c0_8], %9 {strides = array<i32>} : memref<1x16x16x128xbf16, #tpu.memory_space<vmem>>, vector<1x16x16x128xbf16>,
    %cst_9 = arith.constant dense<0.000000e+00> : vector<128xf32>
    %10 = vector.multi_reduction <add>, %4, %cst_9 [0] : vector<256x128xf32> to vector<128xf32>
    %11 = vector.shape_cast %10 : vector<128xf32> to vector<1x128xf32>
    %12 = arith.mulf %4, %4 : vector<256x128xf32>
    %cst_10 = arith.constant dense<0.000000e+00> : vector<128xf32>
    %13 = vector.multi_reduction <add>, %12, %cst_10 [0] : vector<256x128xf32> to vector<128xf32>
    %14 = vector.shape_cast %13 : vector<128xf32> to vector<1x128xf32>
    %15 = tpu.concatenate %11, %14 in 0 : vector<1x128xf32>, vector<1x128xf32> -> vector<2x128xf32>
    %c0_11 = arith.constant 0 : index
    %c0_12 = arith.constant 0 : index
    %c0_13 = arith.constant 0 : index
    %16 = vector.load %arg5[%c0_11, %c0_12, %c0_13] : memref<1x2x128xf32, #tpu.memory_space<vmem>>, vector<1x2x128xf32>
    %17 = vector.shape_cast %16 : vector<1x2x128xf32> to vector<2x128xf32>
    %18 = vector.shape_cast %15 : vector<2x128xf32> to vector<1x2x128xf32>
    tpu.vector_store %arg5[%c0_11, %c0_12, %c0_13], %18 {strides = array<i32>} : memref<1x2x128xf32, #tpu.memory_space<vmem>>, vector<1x2x128xf32>,
    return
  }
  func.func @transform_0(%arg0: i32, %arg1: i32) -> (i32, i32, i32, i32) {
    %c0_i32 = arith.constant 0 : i32
    %c0_i32_0 = arith.constant 0 : i32
    %c0_i32_1 = arith.constant 0 : i32
    return %arg0, %arg1, %c0_i32, %c0_i32_0 : i32, i32, i32, i32
  }
  func.func @transform_1(%arg0: i32, %arg1: i32) -> (i32, i32) {
    %c0_i32 = arith.constant 0 : i32
    %c0_i32_0 = arith.constant 0 : i32
    %c0_i32_1 = arith.constant 0 : i32
    return %c0_i32, %c0_i32_0 : i32, i32
  }
  func.func @transform_2(%arg0: i32, %arg1: i32) -> (i32, i32, i32, i32) {
    %c0_i32 = arith.constant 0 : i32
    %c0_i32_0 = arith.constant 0 : i32
    %c0_i32_1 = arith.constant 0 : i32
    return %arg0, %arg1, %c0_i32, %c0_i32_0 : i32, i32, i32, i32
  }
  func.func @transform_3(%arg0: i32, %arg1: i32) -> (i32, i32, i32) {
    %c1_i32 = arith.constant 1 : i32
    %0 = arith.muli %arg0, %c1_i32 : i32
    %1 = arith.addi %0, %arg1 : i32
    %c0_i32 = arith.constant 0 : i32
    %c0_i32_0 = arith.constant 0 : i32
    %c0_i32_1 = arith.constant 0 : i32
    return %1, %c0_i32, %c0_i32_0 : i32, i32, i32
  }
}

</mosaic_0001>

<bundles_post_ra>
// kernel: tpu_custom_call.1
= control target key start
LH: loop header
LB: loop body
LE: loop exit
PB: predicated region body
PF: predicated region fallthrough
CT: control target
= control target key end

     0   :  { %9 = vsyncpa [#allocation3], 0  ;;  %s2026_s0 = inlined_call_operand.hbm [shape: bf16[2,16,16,128], index: 0, kind: input, shape index: {}]   ;;  %s2027_s1 = inlined_call_operand.hbm [shape: bf16[128,128], index: 1, kind: input, shape index: {}]   ;;  %s2028_s2 = inlined_call_operand.hbm [shape: bf16[2,16,16,128], index: 2, kind: output, shape index: {0}]   ;;  %s2029_s3 = inlined_call_operand.hbm [shape: f32[2,2,128], index: 3, kind: output, shape index: {1}]  }
   0x1   :  { %11 = vsyncpa [#allocation3 + $0x1], 0 }
   0x2   :  { %12 = vsyncpa [#allocation6], 0 }
   0x3   :  { %13 = vsyncpa [#allocation4], 0 }
   0x4   :  { %15 = vsyncpa [#allocation4 + $0x1], 0 }
   0x5   :  { %16 = vsyncpa [#allocation9], 0 }
   0x6   :  { %18 = vsyncpa [#allocation9 + $0x1], 0  ;;  %s1633_s12 = smov 0   ;;  %s1635_s13 = smov 0  }
   0x7   :  { %s1637_s14 = smov 0   ;;  %s1639_s15 = smov 0  }
   0x8   :  { %s1641_s16 = smov 0   ;;  %s1643_s17 = smov 0  }
   0x9 LB: > { %s1028_s18 = sadd.s32 4294967295, %s1603_s17   ;;  %s1029_s19 = sadd.s32 4294967294, %s1603_s17   ;;  %s1603_s17 = sphi %s1643_s17, %s24_s17   ;;  %s1599_s16 = sphi %s1641_s16, %s2053_s16   ;;  %s1595_s15 = sphi %s1639_s15, %s2052_s15   ;;  %s1591_s14 = sphi %s1637_s14, %s2051_s14   ;;  %s1587_s13 = sphi %s1635_s13, %s2050_s13   ;;  %s1583_s12 = sphi %s1633_s12, %s2049_s12  }
   0xa   : > { %p58_p0 = scmp.ne.s32.totalorder %s1587_s13, %s1583_s12  ;;  %p1667_p1 = scmp.eq.s32.totalorder %s1028_s18, 0 }
   0xb   : > { %p1671_p2 = scmp.eq.s32.totalorder %s1028_s18, 1  ;;  %p111_p3 = scmp.eq.s32.totalorder %s1029_s19, 1 }
   0xc   : > { %s2034_s20 = scalar_select %p1667_p1, 1, 0 }
   0xd   : > { %s2035_s21 = scalar_select %p1671_p2, 1, 0 }
   0xe   : > { %p1677_p4 = por %p1667_p1, %p58_p0  ;;  %p1030_p5 = scmp.ge.s32.totalorder %s1603_s17, 1 }
   0xf   : > { %p1682_p6 = por %p111_p3, %p58_p0  ;;  %p146_p7 = scmp.lt.s32.totalorder %s1603_s17, 3 }
  0x10   : > { %s2036_s22 = scalar_select %p1677_p4, 1, 0 }
  0x11   : > { %s2037_s23 = scalar_select %p1682_p6, 1, 0 }
  0x12   : > { %p1687_p8 = pnand %p1030_p5, %p146_p7  ;;  %s1605_s25 = smov [#allocation5]  }
  0x13   : > { %s158_s26 = sshll.u32 %s1605_s25, 4  ;;  %s36_s28 = sadd.s32 1, %s1599_s16  ;;  %s159_s26 = int_to_ptr.vmem [resolvable:$true] %s158_s26 }
  0x14   : > { %s2038_s24 = scalar_select %p1687_p8, 1, 0 }
  0x15   : > { %p1331_p9 = pneg %p1687_p8  ;;  %s1427_s4 = scalar_lea.hbm %s2027_s1, 1024 }
  0x16   : > { %p1428_p12 = scmp.ne.s32.totalorder %s2027_s1, %s1427_s4  ;;  %p1434_p5 = scmp.lt.u32.totalorder %s1427_s4, %s2027_s1 }
  0x17   : > { %p1696_p11 = pnand %p1331_p9, %p1667_p1 }
  0x19   : > { %p1429_p13 = pneg %p1696_p11 }
  0x1b   : > { %p1430_p0 = pnand %p1429_p13, %p1428_p12 }
  0x1d   : > { %p1431_p3 = pneg %p1430_p0 }
  0x1f   : > { %p1436_p7 = pnand %p1434_p5, %p1431_p3 }
  0x21   : > { %1439 = shalt.err (!%p1436_p7)
}
  0x22   : > { %s1440_s9 = scalar_lea.vmem %s159_s26, 1024  ;;  %p1448_p1 = scmp.lt.s32.totalorder %s159_s26, %s159_s26 }
  0x23   : > { %p1441_p9 = scmp.ne.s32.totalorder %s159_s26, %s1440_s9  ;;  %p1449_p4 = scmp.lt.s32.totalorder %s1440_s9, %s1440_s9 }
  0x25   : > { %p1443_p10 = pnand %p1441_p9, %p1429_p13  ;;  %p1450_p8 = por %p1449_p4, %p1448_p1 }
  0x27   : > { %p1444_p6 = pneg %p1443_p10 }
  0x29   : > { %p1451_p2 = pnand %p1450_p8, %p1444_p6 }
  0x2b   : > { %1454 = shalt.err (!%p1451_p2)
}
  0x2c   : > { %s1606_s10 = smov 64   ;;  %s1607_s11 = smov 4  }
  0x2d   : > { %1334 = dma.hbm_to_vmem [thread:$0]  (!%p1696_p11), %s2027_s1, 1024, %s159_s26, [#allocation6], %s1606_s10, %s1606_s10, %s1607_s11  }
  0x2e   : > { %p38_p1 = scmp.ge.s32.totalorder %s36_s28, 2  ;;  %s45_s25 = sadd.s32 1, %s1591_s14 }
  0x2f   : > { %p52_p2 = scmp.ne.s32.totalorder %s1591_s14, %s1587_s13  ;;  %p53_p4 = scmp.eq.s32.totalorder %s1603_s17, 0 }
  0x30   : > { %s2055_s28 = smov (%p38_p1, %s36_s28), 0  ;;  %p2041_p8 = scmp.ne.s32.totalorder %s2035_s21, 0 }
  0x31   : > { %p1726_p6 = por %p53_p4, %p52_p2  ;;  %s40_s30 = ssub.s32 %s1599_s16, %s2055_s28 }
  0x32   : > { %p1732_p10 = por %p2041_p8, %p52_p2  ;;  %p1347_p12 = scmp.lt.s32.totalorder %s1603_s17, 2 }
  0x33   : > { %p43_p11 = scmp.eq.s32.totalorder %s40_s30, 0  ;;  %s172_s26 = sand.u32 1, %s1591_s14  }
  0x34   : > { %s1033_s4 = sshll.u32 %s172_s26, 7  ;;  %s1104_s6 = sshll.u32 %s1599_s16, 11 }
  0x35   : > { %s1741_s5 = scalar_select %p43_p11, %s1591_s14, %s45_s25  }
  0x36   : > { %s1747_s9 = scalar_lea.hbm %s2026_s0, %s1104_s6  ;;  %s176_s21 = scalar_lea.vmem [#allocation2], %s1033_s4 }
  0x37   : > { %s186_s18 = sshll.u32 %s176_s21, 4  ;;  %p1753_p13 = pnand %p1347_p12, %p1726_p6  ;;  %s1749_s18 = int_to_ptr.vmem [resolvable:$true] %s186_s18 }
  0x38   : > { %s1757_s25 = scalar_lea.sflag [#allocation3], %s172_s26  ;;  %s1455_s30 = scalar_lea.hbm %s1747_s9, 2048 }
  0x39   : > { %p1456_p0 = scmp.ne.s32.totalorder %s1747_s9, %s1455_s30  ;;  %p1457_p3 = pneg %p1753_p13 }
  0x3a   : > { %s1460_s29 = scalar_lea.hbm %s2026_s0, 4096  ;;  %p1461_p9 = scmp.lt.u32.totalorder %s1747_s9, %s2026_s0 }
  0x3b   : > { %p1458_p5 = pnand %p1457_p3, %p1456_p0  ;;  %p1462_p1 = scmp.lt.u32.totalorder %s1460_s29, %s1455_s30 }
  0x3c   : > { %p1464_p4 = scmp.lt.u32.totalorder %s1455_s30, %s1747_s9 }
  0x3d   : > { %p1459_p7 = pneg %p1458_p5  ;;  %p1463_p2 = por %p1462_p1, %p1461_p9 }
  0x3f   : > { %p1465_p6 = por %p1464_p4, %p1463_p2 }
  0x41   : > { %p1466_p8 = pnand %p1465_p6, %p1459_p7 }
  0x43   : > { %1469 = shalt.err (!%p1466_p8)
}
  0x44   : > { %s1470_s26 = scalar_lea.vmem %s1749_s18, 2048  ;;  %s1608_s21 = smov [#allocation2]  }
  0x45   : > { %p1471_p12 = scmp.ne.s32.totalorder %s1749_s18, %s1470_s26  ;;  %s1475_s4 = sshll.u32 %s1608_s21, 4  ;;  %s1476_s4 = int_to_ptr.vmem [resolvable:$false] %s1475_s4 }
  0x46   : > { %s1477_s6 = scalar_lea.vmem %s1476_s4, 4096  ;;  %p1478_p5 = scmp.lt.s32.totalorder %s1749_s18, %s1476_s4 }
  0x47   : > { %p1473_p11 = pnand %p1471_p12, %p1457_p3  ;;  %p1479_p9 = scmp.lt.s32.totalorder %s1477_s6, %s1470_s26 }
  0x49   : > { %p1474_p0 = pneg %p1473_p11  ;;  %p1480_p1 = por %p1479_p9, %p1478_p5 }
  0x4b   : > { %p1481_p2 = pnand %p1480_p1, %p1474_p0 }
  0x4d   : > { %1484 = shalt.err (!%p1481_p2)
}
  0x4e   : > { %1338 = dma.hbm_to_vmem [thread:$0]  (!%p1753_p13), %s1747_s9, 2048, %s1749_s18, %s1757_s25, %s1606_s10, %s1606_s10, %s1607_s11  }
  0x4f   : > { %p2044_p3 = scmp.ne.s32.totalorder %s2038_s24, 0 }
  0x50   : > { %s1791_s30 = sand.u32 (!%p2044_p3), 1, %s1587_s13   ;;  %p2045_p7 = scmp.ne.s32.totalorder (!%p2044_p3), %s2036_s22, 0 }
  0x51   : > { %198 = sbr.rel (%p2044_p3) target bundleno = 442 (0x1ba), region = 28  ;;  %s1037_s29 = sshll.u32 (!%p2044_p3), %s1791_s30, 7 }
  0x52   : > { %s201_s7 = scalar_lea.sflag (!%p2044_p3), [#allocation3], %s1791_s30  ;;  %s1797_s19 = scalar_lea.vmem (!%p2044_p3), [#allocation2], %s1037_s29 }
  0x58   : > { %1566 = dma.done.wait (%p2045_p7), %s201_s7, 2048  }
  0x59   : > { %1568 = vsyncadd (%p2045_p7), %s201_s7, 4294965248  ;;  %p2046_p13 = scmp.ne.s32.totalorder %s2034_s20, 0 }
  0x5b   : > { %1570 = dma.done.wait (%p2046_p13), [#allocation6], 1024  }
  0x5c   : > { %1572 = vsyncadd (%p2046_p13), [#allocation6], 4294966272  ;;  %v1403_v0 = vld [vmem:[#allocation5] sm:$0xff]   ;;  %v1404_v1 = vld [vmem:[#allocation5 + $0x8] sm:$0xff]   ;;  %s1837_s20 = scalar_lea.vmem [#allocation7], %s1037_s29  ;;  %s1137_s22 = sshll.u32 %s1595_s15, 11 }
  0x5d   : > { %1257 = vmatprep.subr.bf16.mxu0 %v1403_v0  ;;  %1305 = vmatprep.subr.bf16.mxu1 %v1403_v0  ;;  %v1405_v2 = vld [vmem:[#allocation5 + $0x10] sm:$0xff]   ;;  %v1406_v3 = vld [vmem:[#allocation5 + $0x18] sm:$0xff]   ;;  %v1411_v4 = vld [vmem:[%s1797_s19] sm:$0xff]   ;;  %s884_s24 = sshll.u32 %s1837_s20, 4  ;;  %s1890_s9 = scalar_lea.hbm %s2028_s2, %s1137_s22  ;;  %s1892_s24 = int_to_ptr.vmem [resolvable:$true] %s884_s24 }
  0x5e   : > { %1258 = vmatpush3.bf16.msra.mxu0 %v1403_v0  ;;  %1313 = vmatpush3.bf16.msra.mxu1 %v1403_v0  ;;  %v1407_v5 = vld [vmem:[#allocation5 + $0x20] sm:$0xff]   ;;  %v1408_v6 = vld [vmem:[#allocation5 + $0x28] sm:$0xff]   ;;  %v1409_v8 = vld [vmem:[#allocation5 + $0x30] sm:$0xff]   ;;  %s863_s18 = scalar_lea.sflag [#allocation4], %s1791_s30  ;;  %s1485_s25 = scalar_lea.vmem %s1892_s24, 2048 }
  0x5f   : > { %1259 = vmatprep.subr.bf16.mxu0 %v1404_v1  ;;  %1306 = vmatprep.subr.bf16.mxu1 %v1404_v1  ;;  %v1419_v7 = vld [vmem:[%s1797_s19 + $0x40] sm:$0xff]   ;;  %v1410_v9 = vld [vmem:[#allocation5 + $0x38] sm:$0xff]   ;;  %v1412_v10 = vld [vmem:[%s1797_s19 + $0x8] sm:$0xff]   ;;  %p1486_p4 = scmp.ne.s32.totalorder %s1892_s24, %s1485_s25  ;;  %s1609_s8 = smov [#allocation7]  }
  0x60   : > { %1273 = vmatprep.mubr.bf16.mxu0 %v1411_v4  ;;  %1289 = vmatprep.mubr.bf16.mxu1 %v1419_v7  ;;  %v1420_v11 = vld [vmem:[%s1797_s19 + $0x48] sm:$0xff]   ;;  %v1413_v12 = vld [vmem:[%s1797_s19 + $0x10] sm:$0xff]   ;;  %v1414_v14 = vld [vmem:[%s1797_s19 + $0x18] sm:$0xff]   ;;  %s1489_s26 = sshll.u32 %s1609_s8, 4  ;;  %s1490_s26 = int_to_ptr.vmem [resolvable:$false] %s1489_s26 }
  0x61   : > { %v1421_v13 = vld [vmem:[%s1797_s19 + $0x50] sm:$0xff]   ;;  %v1422_v15 = vld [vmem:[%s1797_s19 + $0x58] sm:$0xff]   ;;  %v1415_v16 = vld [vmem:[%s1797_s19 + $0x20] sm:$0xff]   ;;  %p1487_p6 = pnand %p1486_p4, %p1732_p10  ;;  %s1491_s21 = scalar_lea.vmem %s1490_s26, 4096 }
  0x62   : > { %1260 = vmatpush3.bf16.msra.mxu0 %v1404_v1  ;;  %1314 = vmatpush3.bf16.msra.mxu1 %v1404_v1  ;;  %v1423_v17 = vld [vmem:[%s1797_s19 + $0x60] sm:$0xff]   ;;  %v1416_v18 = vld [vmem:[%s1797_s19 + $0x28] sm:$0xff]   ;;  %v1417_v20 = vld [vmem:[%s1797_s19 + $0x30] sm:$0xff]   ;;  %p1492_p12 = scmp.lt.s32.totalorder %s1892_s24, %s1490_s26  ;;  %p1493_p11 = scmp.lt.s32.totalorder %s1491_s21, %s1485_s25 }
  0x63   : > { %1261 = vmatprep.subr.bf16.mxu0 %v1405_v2  ;;  %1307 = vmatprep.subr.bf16.mxu1 %v1405_v2  ;;  %v1424_v19 = vld [vmem:[%s1797_s19 + $0x68] sm:$0xff]   ;;  %v1425_v21 = vld [vmem:[%s1797_s19 + $0x70] sm:$0xff]   ;;  %v1418_v22 = vld [vmem:[%s1797_s19 + $0x38] sm:$0xff]   ;;  %p1488_p8 = pneg %p1487_p6 }
  0x64   : > { %v1426_v23 = vld [vmem:[%s1797_s19 + $0x78] sm:$0xff]   ;;  %p1494_p0 = por %p1493_p11, %p1492_p12 }
  0x66   : > { %1262 = vmatpush3.bf16.msra.mxu0 %v1405_v2  ;;  %1315 = vmatpush3.bf16.msra.mxu1 %v1405_v2  ;;  %p1495_p5 = pnand %p1494_p0, %p1488_p8 }
  0x67   : > { %1263 = vmatprep.subr.bf16.mxu0 %v1406_v3  ;;  %1308 = vmatprep.subr.bf16.mxu1 %v1406_v3 }
  0x6a   : > { %1264 = vmatpush3.bf16.msra.mxu0 %v1406_v3  ;;  %1316 = vmatpush3.bf16.msra.mxu1 %v1406_v3 }
  0x6b   : > { %1265 = vmatprep.subr.bf16.mxu0 %v1407_v5  ;;  %1309 = vmatprep.subr.bf16.mxu1 %v1407_v5 }
  0x6e   : > { %1266 = vmatpush3.bf16.msra.mxu0 %v1407_v5  ;;  %1317 = vmatpush3.bf16.msra.mxu1 %v1407_v5 }
  0x6f   : > { %1267 = vmatprep.subr.bf16.mxu0 %v1408_v6  ;;  %1310 = vmatprep.subr.bf16.mxu1 %v1408_v6 }
  0x72   : > { %1268 = vmatpush3.bf16.msra.mxu0 %v1408_v6  ;;  %1318 = vmatpush3.bf16.msra.mxu1 %v1408_v6 }
  0x73   : > { %1269 = vmatprep.subr.bf16.mxu0 %v1409_v8  ;;  %1311 = vmatprep.subr.bf16.mxu1 %v1409_v8 }
  0x76   : > { %1270 = vmatpush3.bf16.msra.mxu0 %v1409_v8  ;;  %1319 = vmatpush3.bf16.msra.mxu1 %v1409_v8 }
  0x77   : > { %1271 = vmatprep.subr.bf16.mxu0 %v1410_v9  ;;  %1312 = vmatprep.subr.bf16.mxu1 %v1410_v9 }
  0x7a   : > { %1272 = vmatpush3.bf16.msra.mxu0 %v1410_v9  ;;  %1320 = vmatpush3.bf16.msra.mxu1 %v1410_v9 }
  0x7d   : > { %1274 = vmatmul.mubr.bf16.vlgmr.msra.gmra.mrb[0].mxu0 %v1412_v10  ;;  %1290 = vmatmul.mubr.bf16.vlgmr.msra.gmra.mrb[0].mxu1 %v1420_v11 }
  0x7e   : > { %1277 = vmatprep.mubr.bf16.mxu0 %v1413_v12  ;;  %1293 = vmatprep.mubr.bf16.mxu1 %v1421_v13 }
  0x85   : > { %1278 = vmatmul.mubr.bf16.gmra.mrb[4].mxu0 %v1414_v14  ;;  %1294 = vmatmul.mubr.bf16.gmra.mrb[4].mxu1 %v1422_v15 }
  0x86   : > { %1281 = vmatprep.mubr.bf16.mxu0 %v1415_v16  ;;  %1297 = vmatprep.mubr.bf16.mxu1 %v1423_v17 }
  0x8d   : > { %1282 = vmatmul.mubr.bf16.gmra.mrb[8].mxu0 %v1416_v18  ;;  %1298 = vmatmul.mubr.bf16.gmra.mrb[8].mxu1 %v1424_v19 }
  0x8e   : > { %1285 = vmatprep.mubr.bf16.mxu0 %v1417_v20  ;;  %1301 = vmatprep.mubr.bf16.mxu1 %v1425_v21 }
  0x95   : > { %1286 = vmatmul.mubr.bf16.gmra.mrb[12].mxu0 %v1418_v22  ;;  %1302 = vmatmul.mubr.bf16.gmra.mrb[12].mxu1 %v1426_v23 }
 0x150   : > { %v1275_v24 = vpop.f32.mrb[0].mxu0  ;;  %v1823_v25 = vpop.f32.mrb[0].mxu1 }
 0x151   : > { %v466_v26 = vpop.f32.mrb[1].mxu0  ;;  %v1825_v27 = vpop.f32.mrb[1].mxu1  ;;  %v792_v39 = vmul.f32 %v1275_v24, %v1275_v24 }
 0x152   : > { %v1276_v28 = vpop.f32.mrb[2].mxu0  ;;  %v1827_v29 = vpop.f32.mrb[2].mxu1  ;;  %v790_v30 = vmul.f32 %v466_v26, %v466_v26 }
 0x153   : > { %v1146_v31 = vpack.c.bf16 %v1276_v28, %v1275_v24  ;;  %v469_v32 = vpop.f32.mrb[3].mxu0  ;;  %v1186_v33 = vpack.c.bf16 %v1827_v29, %v1823_v25  ;;  %v1831_v34 = vpop.f32.mrb[3].mxu1  ;;  %v793_v42 = vmul.f32 %v1276_v28, %v1276_v28 }
 0x154   : > { %v1141_v35 = vpack.c.bf16 %v469_v32, %v466_v26  ;;  %v753_v36 = vadd.f32 %v469_v32, %v466_v26  ;;  %v791_v37 = vmul.f32 %v469_v32, %v469_v32  ;;  %v1181_v38 = vpack.c.bf16 %v1831_v34, %v1825_v27 }
 0x155   : > { %1218 = vst [vmem:[%s1837_s20 + $0x8] sm:$0xff] %v1146_v31   ;;  %1226 = vst [vmem:[%s1837_s20 + $0x48] sm:$0xff] %v1186_v33  }
 0x156   : > { %1142 = vst [vmem:[%s1837_s20] sm:$0xff] %v1141_v35   ;;  %v754_v40 = vadd.f32 %v1275_v24, %v753_v36  ;;  %v822_v41 = vadd.f32 %v791_v37, %v790_v30  ;;  %1225 = vst [vmem:[%s1837_s20 + $0x40] sm:$0xff] %v1181_v38  }
 0x158   : > { %v823_v43 = vadd.f32 %v822_v41, %v792_v39  ;;  %v1279_v44 = vpop.f32.mrb[4].mxu0  ;;  %v755_v45 = vadd.f32 %v1276_v28, %v754_v40  ;;  %v1843_v46 = vpop.f32.mrb[4].mxu1 }
 0x159   : > { %v482_v47 = vpop.f32.mrb[5].mxu0  ;;  %v1845_v48 = vpop.f32.mrb[5].mxu1  ;;  %v796_v63 = vmul.f32 %v1279_v44, %v1279_v44 }
 0x15a   : > { %v756_v49 = vadd.f32 %v755_v45, %v482_v47  ;;  %v794_v50 = vmul.f32 %v482_v47, %v482_v47  ;;  %v824_v51 = vadd.f32 %v823_v43, %v793_v42  ;;  %v1280_v52 = vpop.f32.mrb[6].mxu0  ;;  %v1847_v53 = vpop.f32.mrb[6].mxu1 }
 0x15b   : > { %v1156_v54 = vpack.c.bf16 %v1280_v52, %v1279_v44  ;;  %v485_v55 = vpop.f32.mrb[7].mxu0  ;;  %v1196_v56 = vpack.c.bf16 %v1847_v53, %v1843_v46  ;;  %v1851_v57 = vpop.f32.mrb[7].mxu1  ;;  %v797_v2 = vmul.f32 %v1280_v52, %v1280_v52 }
 0x15c   : > { %v825_v58 = vadd.f32 %v824_v51, %v794_v50  ;;  %v1151_v59 = vpack.c.bf16 %v485_v55, %v482_v47  ;;  %v757_v60 = vadd.f32 %v756_v49, %v485_v55  ;;  %v795_v61 = vmul.f32 %v485_v55, %v485_v55 }
 0x15d   : > { %1220 = vst [vmem:[%s1837_s20 + $0x18] sm:$0xff] %v1156_v54   ;;  %1228 = vst [vmem:[%s1837_s20 + $0x58] sm:$0xff] %v1196_v56   ;;  %v1191_v62 = vpack.c.bf16 %v1851_v57, %v1845_v48 }
 0x15e   : > { %1219 = vst [vmem:[%s1837_s20 + $0x10] sm:$0xff] %v1151_v59   ;;  %v758_v0 = vadd.f32 %v1279_v44, %v757_v60  ;;  %v826_v1 = vadd.f32 %v825_v58, %v795_v61  ;;  %v806_v61 = vmul.f32 %v1825_v27, %v1825_v27 }
 0x15f   : > { %1227 = vst [vmem:[%s1837_s20 + $0x50] sm:$0xff] %v1191_v62  }
 0x160   : > { %v827_v3 = vadd.f32 %v826_v1, %v796_v63  ;;  %v1283_v4 = vpop.f32.mrb[8].mxu0  ;;  %v759_v5 = vadd.f32 %v1280_v52, %v758_v0  ;;  %v1859_v6 = vpop.f32.mrb[8].mxu1 }
 0x161   : > { %v498_v7 = vpop.f32.mrb[9].mxu0  ;;  %v1861_v8 = vpop.f32.mrb[9].mxu1  ;;  %v800_v23 = vmul.f32 %v1283_v4, %v1283_v4 }
 0x162   : > { %v760_v9 = vadd.f32 %v759_v5, %v498_v7  ;;  %v798_v10 = vmul.f32 %v498_v7, %v498_v7  ;;  %v828_v11 = vadd.f32 %v827_v3, %v797_v2  ;;  %v1284_v12 = vpop.f32.mrb[10].mxu0  ;;  %v1863_v13 = vpop.f32.mrb[10].mxu1 }
 0x163   : > { %v1166_v14 = vpack.c.bf16 %v1284_v12, %v1283_v4  ;;  %v501_v15 = vpop.f32.mrb[11].mxu0  ;;  %v1206_v16 = vpack.c.bf16 %v1863_v13, %v1859_v6  ;;  %v1867_v17 = vpop.f32.mrb[11].mxu1  ;;  %v801_v28 = vmul.f32 %v1284_v12, %v1284_v12 }
 0x164   : > { %v829_v18 = vadd.f32 %v828_v11, %v798_v10  ;;  %v1161_v19 = vpack.c.bf16 %v501_v15, %v498_v7  ;;  %v761_v20 = vadd.f32 %v760_v9, %v501_v15  ;;  %v799_v21 = vmul.f32 %v501_v15, %v501_v15 }
 0x165   : > { %1222 = vst [vmem:[%s1837_s20 + $0x28] sm:$0xff] %v1166_v14   ;;  %1230 = vst [vmem:[%s1837_s20 + $0x68] sm:$0xff] %v1206_v16   ;;  %v1201_v22 = vpack.c.bf16 %v1867_v17, %v1861_v8 }
 0x166   : > { %1221 = vst [vmem:[%s1837_s20 + $0x20] sm:$0xff] %v1161_v19   ;;  %v762_v24 = vadd.f32 %v1283_v4, %v761_v20  ;;  %v830_v26 = vadd.f32 %v829_v18, %v799_v21 }
 0x167   : > { %1229 = vst [vmem:[%s1837_s20 + $0x60] sm:$0xff] %v1201_v22  }
 0x168   : > { %v831_v30 = vadd.f32 %v830_v26, %v800_v23  ;;  %v1287_v31 = vpop.f32.mrb[12].mxu0  ;;  %v763_v32 = vadd.f32 %v1284_v12, %v762_v24  ;;  %v1875_v33 = vpop.f32.mrb[12].mxu1 }
 0x169   : > { %v514_v35 = vpop.f32.mrb[13].mxu0  ;;  %v1877_v36 = vpop.f32.mrb[13].mxu1  ;;  %v804_v54 = vmul.f32 %v1287_v31, %v1287_v31 }
 0x16a   : > { %v764_v37 = vadd.f32 %v763_v32, %v514_v35  ;;  %v802_v38 = vmul.f32 %v514_v35, %v514_v35  ;;  %v832_v39 = vadd.f32 %v831_v30, %v801_v28  ;;  %v1288_v40 = vpop.f32.mrb[14].mxu0  ;;  %v1881_v41 = vpop.f32.mrb[14].mxu1 }
 0x16b   : > { %v1176_v42 = vpack.c.bf16 %v1288_v40, %v1287_v31  ;;  %v517_v43 = vpop.f32.mrb[15].mxu0  ;;  %v1216_v44 = vpack.c.bf16 %v1881_v41, %v1875_v33  ;;  %v1885_v45 = vpop.f32.mrb[15].mxu1  ;;  %v805_v58 = vmul.f32 %v1288_v40, %v1288_v40 }
 0x16c   : > { %v833_v47 = vadd.f32 %v832_v39, %v802_v38  ;;  %v1171_v49 = vpack.c.bf16 %v517_v43, %v514_v35  ;;  %v765_v50 = vadd.f32 %v764_v37, %v517_v43  ;;  %v803_v51 = vmul.f32 %v517_v43, %v517_v43 }
 0x16d   : > { %1224 = vst [vmem:[%s1837_s20 + $0x38] sm:$0xff] %v1176_v42   ;;  %1232 = vst [vmem:[%s1837_s20 + $0x78] sm:$0xff] %v1216_v44   ;;  %v1211_v52 = vpack.c.bf16 %v1885_v45, %v1877_v36 }
 0x16e   : > { %1223 = vst [vmem:[%s1837_s20 + $0x30] sm:$0xff] %v1171_v49   ;;  %v766_v55 = vadd.f32 %v1287_v31, %v765_v50  ;;  %v834_v56 = vadd.f32 %v833_v47, %v803_v51 }
 0x16f   : > { %1231 = vst [vmem:[%s1837_s20 + $0x70] sm:$0xff] %v1211_v52  }
 0x170   : > { %v835_v59 = vadd.f32 %v834_v56, %v804_v54  ;;  %v767_v60 = vadd.f32 %v1288_v40, %v766_v55 }
 0x171   : > { %1498 = shalt.err (!%p1495_p5)
}
 0x172   : > { %s1499_s4 = scalar_lea.hbm %s1890_s9, 2048  ;;  %s1503_s7 = scalar_lea.hbm %s2028_s2, 4096 }
 0x173   : > { %p1500_p9 = scmp.ne.s32.totalorder %s1890_s9, %s1499_s4  ;;  %p1504_p3 = scmp.lt.u32.totalorder %s1890_s9, %s2028_s2 }
 0x174   : > { %p1505_p7 = scmp.lt.u32.totalorder %s1503_s7, %s1499_s4  ;;  %p1507_p4 = scmp.lt.u32.totalorder %s1499_s4, %s1890_s9 }
 0x175   : > { %p1501_p1 = pnand %p1500_p9, %p1732_p10 }
 0x176   : > { %p1506_p13 = por %p1505_p7, %p1504_p3 }
 0x177   : > { %p1502_p2 = pneg %p1501_p1 }
 0x178   : > { %p1508_p6 = por %p1507_p4, %p1506_p13 }
 0x17a   : > { %p1509_p8 = pnand %p1508_p6, %p1502_p2 }
 0x17c   : > { %1512 = shalt.err (!%p1509_p8)
}
 0x17d   : > { %s1610_s22 = smov 64   ;;  %s1611_s10 = smov 4   ;;  %v768_v62 = vadd.f32 %v767_v60, %v1825_v27  ;;  %v836_v63 = vadd.f32 %v835_v59, %v805_v58  ;;  %v807_v2 = vmul.f32 %v1831_v34, %v1831_v34  ;;  %v808_v3 = vmul.f32 %v1823_v25, %v1823_v25 }
 0x17e   : > { %1327 = dma.vmem_to_hbm [thread:$0]  (%p1732_p10), %s1892_s24, 2048, %s1890_s9, %s863_s18, %s1610_s22, %s1610_s22, %s1611_s10   ;;  %v809_v7 = vmul.f32 %v1827_v29, %v1827_v29  ;;  %v810_v27 = vmul.f32 %v1845_v48, %v1845_v48  ;;  %v811_v15 = vmul.f32 %v1851_v57, %v1851_v57  ;;  %v815_v24 = vmul.f32 %v1867_v17, %v1867_v17 }
 0x17f   : > { %v837_v0 = vadd.f32 %v836_v63, %v806_v61  ;;  %v769_v1 = vadd.f32 %v768_v62, %v1831_v34  ;;  %v820_v38 = vmul.f32 %v1875_v33, %v1875_v33  ;;  %s1040_s24 = sshll.u32 %s1791_s30, 1  ;;  %s1101_s11 = sshll.u32 %s1595_s15, 5  ;;  %vm859_vm0 = vcmask 1040384  }
 0x180   : > { %s235_s9 = scalar_lea.vmem [#allocation8], %s1040_s24  ;;  %s1977_s26 = scalar_lea.hbm %s2029_s3, %s1101_s11 }
 0x181   : > { %v770_v4 = vadd.f32 %v1823_v25, %v769_v1  ;;  %v838_v5 = vadd.f32 %v837_v0, %v807_v2  ;;  %v812_v25 = vmul.f32 %v1843_v46, %v1843_v46  ;;  %s901_s18 = sshll.u32 %s235_s9, 4  ;;  %s868_s21 = scalar_lea.sflag [#allocation9], %s1791_s30  ;;  %s1979_s18 = int_to_ptr.vmem [resolvable:$true] %s901_s18 }
 0x182   : > { %s1513_s4 = scalar_lea.vmem %s1979_s18, 32  ;;  %s1612_s15 = smov [#allocation8]  }
 0x183   : > { %v839_v9 = vadd.f32 %v838_v5, %v808_v3  ;;  %v771_v10 = vadd.f32 %v1827_v29, %v770_v4  ;;  %v813_v29 = vmul.f32 %v1847_v53, %v1847_v53  ;;  %p1514_p12 = scmp.ne.s32.totalorder %s1979_s18, %s1513_s4  ;;  %s1517_s6 = sshll.u32 %s1612_s15, 4  ;;  %s1518_s6 = int_to_ptr.vmem [resolvable:$false] %s1517_s6 }
 0x184   : > { %s1519_s29 = scalar_lea.vmem %s1518_s6, 64  ;;  %p1520_p5 = scmp.lt.s32.totalorder %s1979_s18, %s1518_s6 }
 0x185   : > { %v772_v11 = vadd.f32 %v771_v10, %v1845_v48  ;;  %v840_v12 = vadd.f32 %v839_v9, %v809_v7  ;;  %v814_v48 = vmul.f32 %v1861_v8, %v1861_v8  ;;  %p1515_p11 = pnand %p1514_p12, %p1732_p10  ;;  %p1521_p9 = scmp.lt.s32.totalorder %s1519_s29, %s1513_s4 }
 0x187   : > { %v841_v14 = vadd.f32 %v840_v12, %v810_v27  ;;  %v773_v34 = vadd.f32 %v772_v11, %v1851_v57  ;;  %p1516_p0 = pneg %p1515_p11  ;;  %p1522_p1 = por %p1521_p9, %p1520_p5 }
 0x189   : > { %v774_v16 = vadd.f32 %v1843_v46, %v773_v34  ;;  %v842_v18 = vadd.f32 %v841_v14, %v811_v15  ;;  %v816_v46 = vmul.f32 %v1859_v6, %v1859_v6  ;;  %p1523_p2 = pnand %p1522_p1, %p1516_p0 }
 0x18b   : > { %v843_v19 = vadd.f32 %v842_v18, %v812_v25  ;;  %v775_v20 = vadd.f32 %v1847_v53, %v774_v16  ;;  %v817_v53 = vmul.f32 %v1863_v13, %v1863_v13 }
 0x18d   : > { %v776_v21 = vadd.f32 %v775_v20, %v1861_v8  ;;  %v844_v22 = vadd.f32 %v843_v19, %v813_v29  ;;  %v818_v8 = vmul.f32 %v1877_v36, %v1877_v36 }
 0x18f   : > { %v845_v23 = vadd.f32 %v844_v22, %v814_v48  ;;  %v777_v57 = vadd.f32 %v776_v21, %v1867_v17 }
 0x191   : > { %v778_v26 = vadd.f32 %v1859_v6, %v777_v57  ;;  %v846_v28 = vadd.f32 %v845_v23, %v815_v24  ;;  %v819_v6 = vmul.f32 %v1885_v45, %v1885_v45 }
 0x193   : > { %v847_v30 = vadd.f32 %v846_v28, %v816_v46  ;;  %v779_v31 = vadd.f32 %v1863_v13, %v778_v26  ;;  %v821_v13 = vmul.f32 %v1881_v41, %v1881_v41 }
 0x195   : > { %v780_v32 = vadd.f32 %v779_v31, %v1877_v36  ;;  %v848_v35 = vadd.f32 %v847_v30, %v817_v53 }
 0x197   : > { %v849_v17 = vadd.f32 %v848_v35, %v818_v8  ;;  %v781_v37 = vadd.f32 %v780_v32, %v1885_v45 }
 0x199   : > { %v782_v39 = vadd.f32 %v1875_v33, %v781_v37  ;;  %v850_v40 = vadd.f32 %v849_v17, %v819_v6 }
 0x19b   : > { %v783_v36 = vadd.f32 %v1881_v41, %v782_v39  ;;  %v851_v42 = vadd.f32 %v850_v40, %v820_v38 }
 0x19d   : > { %v784_v43 = vrot.slane %v783_v36, 4  ;;  %v852_v44 = vadd.f32 %v851_v42, %v821_v13 }
 0x19f   : > { %v785_v47 = vadd.f32 %v784_v43, %v783_v36  ;;  %v853_v49 = vrot.slane %v852_v44, 4 }
 0x1a1   : > { %v786_v50 = vrot.slane %v785_v47, 2  ;;  %v854_v51 = vadd.f32 %v853_v49, %v852_v44 }
 0x1a3   : > { %v787_v45 = vadd.f32 %v786_v50, %v785_v47  ;;  %v855_v52 = vrot.slane %v854_v51, 2 }
 0x1a5   : > { %v788_v54 = vrot.slane %v787_v45, 1  ;;  %v856_v33 = vadd.f32 %v855_v52, %v854_v51 }
 0x1a7   : > { %v857_v55 = vrot.slane %v856_v33, 1  ;;  %v789_v41 = vadd.f32 %v788_v54, %v787_v45 }
 0x1a9   : > { %v858_v56 = vadd.f32 %v857_v55, %v856_v33 }
 0x1ab   : > { %v860_v58 = vsel %vm859_vm0, %v789_v41, %v858_v56 }
 0x1ac   : > { %861 = vst [vmem:[%s235_s9] sm:$0x3] %v860_v58 }
 0x1ad   : > { %1526 = shalt.err (!%p1523_p2)
}
 0x1ae   : > { %s1527_s30 = scalar_lea.hbm %s1977_s26, 32  ;;  %s1531_s20 = scalar_lea.hbm %s2029_s3, 64 }
 0x1af   : > { %p1528_p3 = scmp.ne.s32.totalorder %s1977_s26, %s1527_s30  ;;  %p1532_p4 = scmp.lt.u32.totalorder %s1977_s26, %s2029_s3 }
 0x1b0   : > { %p1533_p6 = scmp.lt.u32.totalorder %s1531_s20, %s1527_s30  ;;  %p1535_p12 = scmp.lt.u32.totalorder %s1527_s30, %s1977_s26 }
 0x1b1   : > { %p1529_p7 = pnand %p1528_p3, %p1732_p10 }
 0x1b2   : > { %p1534_p8 = por %p1533_p6, %p1532_p4 }
 0x1b3   : > { %p1530_p13 = pneg %p1529_p7 }
 0x1b4   : > { %p1536_p11 = por %p1535_p12, %p1534_p8 }
 0x1b6   : > { %p1537_p0 = pnand %p1536_p11, %p1530_p13 }
 0x1b8   : > { %1540 = shalt.err (!%p1537_p0)
}
 0x1b9   : > { %1328 = dma.vmem_to_hbm [thread:$0]  (%p1732_p10), %s1979_s18, 32, %s1977_s26, %s868_s21  }
 0x1ba PF: > { %s913_s24 = sand.u32 1, %s1583_s12   ;;  %p2047_p5 = scmp.ne.s32.totalorder %s2037_s23, 0 }
 0x1bb   : > { %p2048_p9 = scmp.ge.s32.totalorder %s1603_s17, 2  ;;  %s914_s11 = scalar_lea.sflag [#allocation4], %s913_s24 }
 0x1bd   : > { %p1340_p1 = pnand %p2048_p9, %p2047_p5 }
 0x1bf   : > { %1574 = dma.done.wait (!%p1340_p1), %s914_s11, 2048  }
 0x1c0   : > { %1576 = vsyncadd (!%p1340_p1), %s914_s11, 4294965248  ;;  %s923_s9 = scalar_lea.sflag [#allocation9], %s913_s24 }
 0x1c1   : > { %1578 = dma.done.wait (!%p1340_p1), %s923_s9, 32  }
 0x1c2   : > { %1580 = vsyncadd (!%p1340_p1), %s923_s9, 4294967264  ;;  %s24_s17 = sadd.s32 1, %s1603_s17   ;;  %s2049_s12 = smov %s1587_s13 }
 0x1c3   : > { %p21_p2 = scmp.ge.s32.totalorder %s24_s17, 4   ;;  %s2050_s13 = smov %s1591_s14 }
 0x1c4   : > { %s2051_s14 = smov %s1741_s5  ;;  %s2052_s15 = smov %s1599_s16 }
 0x1c5   : > { %s2053_s16 = smov %s2055_s28  ;;  %23 = sbr.rel (!%p21_p2) target bundleno = 9 (0x9), region = 94 }
 0x1cc   :  { %928 = vsyncpa [#allocation3], 1 }
 0x1cd   :  { %930 = vsyncpa [#allocation3 + $0x1], 1 }
 0x1ce   :  { %931 = vsyncpa [#allocation6], 1 }
 0x1cf   :  { %932 = vsyncpa [#allocation4], 1 }
 0x1d0   :  { %934 = vsyncpa [#allocation4 + $0x1], 1 }
 0x1d1   :  { %935 = vsyncpa [#allocation9], 1 }
 0x1d2   :  { %937 = vsyncpa [#allocation9 + $0x1], 1 }

</bundles_post_ra>
